<compile_context>
chip_gen: v5e
topology: v5e:2x2
jax: 0.10.0
libtpu: 0.0.40
codegen_flags: <defaults>
</compile_context>

<pallas_src>
import math

import jax
import jax.numpy as jnp
from jax.experimental import pallas as pl
from jax.experimental.pallas import tpu as pltpu

B = 2            # batch
D_IN = 63        # fc1 input
H1 = 126         # fc1 / fc2 width
N_OUT = 100      # fc3 output


def prenetwork_kernel(x_ref, w1_ref, b1_ref, w2_ref, b2_ref, w3_ref, b3_ref,
                      out_ref):
    # fc1 (no activation in the original module), Dropout = identity at inference
    h1 = jnp.dot(x_ref[...], w1_ref[...],
                 preferred_element_type=jnp.float32) + b1_ref[...]          # (B, 126)
    # fc2 (no activation), Dropout = identity
    h2 = jnp.dot(h1, w2_ref[...],
                 preferred_element_type=jnp.float32) + b2_ref[...]          # (B, 126)
    # fc3 + ReLU, Dropout = identity
    h3 = jnp.dot(h2, w3_ref[...],
                 preferred_element_type=jnp.float32) + b3_ref[...]          # (B, 100)
    out_ref[...] = jnp.maximum(h3, 0.0)


def prenetwork_forward(x, params):
    """x: (batch, 63) float32 -> (batch, 100) float32."""
    w1, b1, w2, b2, w3, b3 = params
    bx = x.shape[0]

    # Pre-transpose weights on the host so the kernel does plain (M,K)x(K,N) dots.
    w1t, w2t, w3t = w1.T, w2.T, w3.T                    # (63,126), (126,126), (126,100)
    b1r, b2r, b3r = (b.reshape(1, -1) for b in (b1, b2, b3))

    vmem = pl.BlockSpec(memory_space=pltpu.MemorySpace.VMEM)  # whole array resident in VMEM

    out = pl.pallas_call(
        prenetwork_kernel,
        out_shape=jax.ShapeDtypeStruct((bx, N_OUT), jnp.float32),
        in_specs=[vmem] * 7,
        out_specs=vmem,
    )(x, w1t, b1r, w2t, b2r, w3t, b3r)
    return out


def init_params(key):
    # PyTorch nn.Linear default init: U(-1/sqrt(fan_in), 1/sqrt(fan_in)).
    def uniform(k, shape, fan_in):
        bound = 1.0 / math.sqrt(fan_in)
        return jax.random.uniform(k, shape, jnp.float32, -bound, bound)

    ks = jax.random.split(key, 6)
    w1 = uniform(ks[0], (H1, D_IN), D_IN)
    b1 = uniform(ks[1], (H1,), D_IN)
    w2 = uniform(ks[2], (H1, H1), H1)
    b2 = uniform(ks[3], (H1,), H1)
    w3 = uniform(ks[4], (N_OUT, H1), H1)
    b3 = uniform(ks[5], (N_OUT,), H1)
    return (w1, b1, w2, b2, w3, b3)


def reference_forward(x, params):
    # Independent plain-JAX reference (inference mode: dropout = identity).
    w1, b1, w2, b2, w3, b3 = params
    h = x @ w1.T + b1
    h = h @ w2.T + b2
    return jnp.maximum(h @ w3.T + b3, 0.0)


if __name__ == "__main__":
    key = jax.random.PRNGKey(0)
    pkey, xkey = jax.random.split(key)
    params = init_params(pkey)
    x = jax.random.normal(xkey, (B, D_IN), jnp.float32)

    out = prenetwork_forward(x, params)
    out = jax.block_until_ready(out)

    ref = reference_forward(x, params)
    assert out.shape == (B, N_OUT), out.shape
    assert jnp.allclose(out, ref, atol=1e-4, rtol=1e-4), float(jnp.max(jnp.abs(out - ref)))
    print("KERNEL_OK")
</pallas_src>

<mosaic_0001>
module attributes {stable_mosaic.version = 11 : i64} {
  func.func @prenetwork_kernel(%arg0: memref<2x63xf32, #tpu.memory_space<vmem>>, %arg1: memref<63x126xf32, #tpu.memory_space<vmem>>, %arg2: memref<1x126xf32, #tpu.memory_space<vmem>>, %arg3: memref<126x126xf32, #tpu.memory_space<vmem>>, %arg4: memref<1x126xf32, #tpu.memory_space<vmem>>, %arg5: memref<126x100xf32, #tpu.memory_space<vmem>>, %arg6: memref<1x100xf32, #tpu.memory_space<vmem>>, %arg7: memref<2x100xf32, #tpu.memory_space<vmem>>) attributes {dimension_semantics = [], scalar_prefetch = 0 : i64, scratch_operands = 0 : i64, tpu.core_type = #tpu.core_type<tc>} {
    %c0 = arith.constant 0 : index
    %c0_0 = arith.constant 0 : index
    %0 = vector.load %arg0[%c0, %c0_0] : memref<2x63xf32, #tpu.memory_space<vmem>>, vector<2x63xf32>
    %c0_1 = arith.constant 0 : index
    %c0_2 = arith.constant 0 : index
    %1 = vector.load %arg1[%c0_1, %c0_2] : memref<63x126xf32, #tpu.memory_space<vmem>>, vector<63x126xf32>
    %cst = arith.constant dense<0.000000e+00> : vector<2x126xf32>
    %2 = tpu.matmul %0, %1, %cst {dimension_numbers = #tpu.dot_dimension_numbers<[1], [0], [0], [1], [0, 0, 1, 1], [], []>} : vector<2x63xf32>, vector<63x126xf32>, vector<2x126xf32> -> vector<2x126xf32>
    %c0_3 = arith.constant 0 : index
    %c0_4 = arith.constant 0 : index
    %3 = vector.load %arg2[%c0_3, %c0_4] : memref<1x126xf32, #tpu.memory_space<vmem>>, vector<1x126xf32>
    %4 = vector.broadcast %3 : vector<1x126xf32> to vector<2x126xf32>
    %5 = arith.addf %2, %4 : vector<2x126xf32>
    %c0_5 = arith.constant 0 : index
    %c0_6 = arith.constant 0 : index
    %6 = vector.load %arg3[%c0_5, %c0_6] : memref<126x126xf32, #tpu.memory_space<vmem>>, vector<126x126xf32>
    %cst_7 = arith.constant dense<0.000000e+00> : vector<2x126xf32>
    %7 = tpu.matmul %5, %6, %cst_7 {dimension_numbers = #tpu.dot_dimension_numbers<[1], [0], [0], [1], [0, 0, 1, 1], [], []>} : vector<2x126xf32>, vector<126x126xf32>, vector<2x126xf32> -> vector<2x126xf32>
    %c0_8 = arith.constant 0 : index
    %c0_9 = arith.constant 0 : index
    %8 = vector.load %arg4[%c0_8, %c0_9] : memref<1x126xf32, #tpu.memory_space<vmem>>, vector<1x126xf32>
    %9 = vector.broadcast %8 : vector<1x126xf32> to vector<2x126xf32>
    %10 = arith.addf %7, %9 : vector<2x126xf32>
    %c0_10 = arith.constant 0 : index
    %c0_11 = arith.constant 0 : index
    %11 = vector.load %arg5[%c0_10, %c0_11] : memref<126x100xf32, #tpu.memory_space<vmem>>, vector<126x100xf32>
    %cst_12 = arith.constant dense<0.000000e+00> : vector<2x100xf32>
    %12 = tpu.matmul %10, %11, %cst_12 {dimension_numbers = #tpu.dot_dimension_numbers<[1], [0], [0], [1], [0, 0, 1, 1], [], []>} : vector<2x126xf32>, vector<126x100xf32>, vector<2x100xf32> -> vector<2x100xf32>
    %c0_13 = arith.constant 0 : index
    %c0_14 = arith.constant 0 : index
    %13 = vector.load %arg6[%c0_13, %c0_14] : memref<1x100xf32, #tpu.memory_space<vmem>>, vector<1x100xf32>
    %14 = vector.broadcast %13 : vector<1x100xf32> to vector<2x100xf32>
    %15 = arith.addf %12, %14 : vector<2x100xf32>
    %cst_15 = arith.constant 0.000000e+00 : f32
    %16 = vector.broadcast %cst_15 : f32 to vector<2x100xf32>
    %17 = arith.maximumf %15, %16 : vector<2x100xf32>
    %c0_16 = arith.constant 0 : index
    %c0_17 = arith.constant 0 : index
    %18 = vector.load %arg7[%c0_16, %c0_17] : memref<2x100xf32, #tpu.memory_space<vmem>>, vector<2x100xf32>
    tpu.vector_store %arg7[%c0_16, %c0_17], %17 {strides = array<i32>} : memref<2x100xf32, #tpu.memory_space<vmem>>, vector<2x100xf32>,
    return
  }
}

</mosaic_0001>

<bundles_post_ra>
// kernel: tpu_custom_call.1
= control target key start
LH: loop header
LB: loop body
LE: loop exit
PB: predicated region body
PF: predicated region fallthrough
CT: control target
= control target key end

     0   :  { %vm44_vm0 = vcmask 1046528   ;;  %vm92_vm1 = vcmask 1045504   ;;  %s395_s0 = inlined_call_operand.vmem [shape: f32[2,63], index: 0, kind: input, shape index: {}]   ;;  %s396_s1 = inlined_call_operand.vmem [shape: f32[63,126], index: 1, kind: input, shape index: {}]   ;;  %s397_s2 = inlined_call_operand.vmem [shape: f32[1,126], index: 2, kind: input, shape index: {}]   ;;  %s398_s3 = inlined_call_operand.vmem [shape: f32[126,126], index: 3, kind: input, shape index: {}]   ;;  %s399_s4 = inlined_call_operand.vmem [shape: f32[1,126], index: 4, kind: input, shape index: {}]   ;;  %s400_s5 = inlined_call_operand.vmem [shape: f32[126,100], index: 5, kind: input, shape index: {}]   ;;  %s401_s6 = inlined_call_operand.vmem [shape: f32[1,100], index: 6, kind: input, shape index: {}]   ;;  %s402_s7 = inlined_call_operand.hbm [shape: f32[2,100], index: 7, kind: output, shape index: {}]  }
   0x1   :  { %v35_v0 = vld [vmem:[%s396_s1 + $0x38] sm:$0x7f]  ;;  %v34_v1 = vld [vmem:[%s396_s1 + $0x30] sm:$0xff]  ;;  %v33_v2 = vld [vmem:[%s396_s1 + $0x28] sm:$0xff] }
   0x2   :  { %181 = vmatpush.msk.msra.mxu0 %vm44_vm0, %v35_v0  ;;  %v83_v3 = vld [vmem:[%s398_s3 + $0x78] sm:$0x3f]  ;;  %v82_v4 = vld [vmem:[%s398_s3 + $0x70] sm:$0xff]  ;;  %v32_v5 = vld [vmem:[%s396_s1 + $0x20] sm:$0xff] }
   0x3   :  { %183 = vmatpush.msk.msra.mxu1 %vm92_vm1, %v83_v3  ;;  %v81_v6 = vld [vmem:[%s398_s3 + $0x68] sm:$0xff]  ;;  %v31_v7 = vld [vmem:[%s396_s1 + $0x18] sm:$0xff]  ;;  %v80_v8 = vld [vmem:[%s398_s3 + $0x60] sm:$0xff] }
   0x4   :  { %57 = vmatpush.msra.mxu0 %v34_v1  ;;  %v30_v9 = vld [vmem:[%s396_s1 + $0x10] sm:$0xff]  ;;  %v79_v10 = vld [vmem:[%s398_s3 + $0x58] sm:$0xff] }
   0x5   :  { %97 = vmatpush.msra.mxu1 %v82_v4 }
   0x6   :  { %58 = vmatpush.msra.mxu0 %v33_v2 }
   0x7   :  { %98 = vmatpush.msra.mxu1 %v81_v6 }
   0x8   :  { %59 = vmatpush.msra.mxu0 %v32_v5 }
   0xa   :  { %60 = vmatpush.msra.mxu0 %v31_v7 }
   0xb   :  { %12 = vsyncpa [#allocation3], 0  ;;  %v29_v11 = vld [vmem:[%s396_s1 + $0x8] sm:$0xff]  ;;  %99 = vmatpush.msra.mxu1 %v80_v8  ;;  %v78_v12 = vld [vmem:[%s398_s3 + $0x50] sm:$0xff]  ;;  %vm40_vm2 = vcmask 515072   ;;  %vm88_vm3 = vcmask 1031168  }
   0xc   :  { %61 = vmatpush.msra.mxu0 %v30_v9  ;;  %v28_v13 = vld [vmem:[%s396_s1] sm:$0xff]  ;;  %v77_v15 = vld [vmem:[%s398_s3 + $0x48] sm:$0xff]  ;;  %v75_v17 = vld [vmem:[%s398_s3 + $0x38] sm:$0xff]  ;;  %s217_s12 = smov [#allocation2]   ;;  %s172_s15 = sshll.u32 %s402_s7, 4  ;;  %vm163_vm4 = vcmask 812032   ;;  %s173_s15 = int_to_ptr.hbm [resolvable:$true] %s172_s15 }
   0xd   :  { %100 = vmatpush.msra.mxu1 %v79_v10  ;;  %v27_v14 = vld [vmem:[%s395_s0] sm:$0x3]  ;;  %v74_v18 = vld [vmem:[%s398_s3 + $0x30] sm:$0xff]  ;;  %v73_v19 = vld [vmem:[%s398_s3 + $0x28] sm:$0xff]  ;;  %s170_s13 = sshll.u32 %s217_s12, 4  ;;  %s171_s13 = int_to_ptr.vmem [resolvable:$true] %s170_s13 }
   0xe   :  { %62 = vmatpush.msra.mxu0 %v29_v11  ;;  %v76_v16 = vld [vmem:[%s398_s3 + $0x40] sm:$0xff]  ;;  %v71_v21 = vld [vmem:[%s398_s3 + $0x18] sm:$0xff]  ;;  %v70_v22 = vld [vmem:[%s398_s3 + $0x10] sm:$0xff] }
   0xf   :  { %101 = vmatpush.msra.mxu1 %v78_v12  ;;  %v72_v20 = vld [vmem:[%s398_s3 + $0x20] sm:$0xff]  ;;  %v69_v23 = vld [vmem:[%s398_s3 + $0x8] sm:$0xff]  ;;  %v131_v25 = vld [vmem:[%s400_s5 + $0x78] sm:$0x3f] }
  0x10   :  { %63 = vmatpush.msra.mxu0 %v28_v13  ;;  %v68_v24 = vld [vmem:[%s398_s3] sm:$0xff]  ;;  %v130_v26 = vld [vmem:[%s400_s5 + $0x70] sm:$0xff]  ;;  %185 = vmatpush.msk.msra.mxu2 %vm92_vm1, %v131_v25  ;;  %v129_v27 = vld [vmem:[%s400_s5 + $0x68] sm:$0xff] }
  0x11   :  { %182 = vmatmul.msk.f32.vlgmr.msra.gmra.mxu0 %vm40_vm2, %v27_v14  ;;  %102 = vmatpush.msra.mxu1 %v77_v15  ;;  %v128_v28 = vld [vmem:[%s400_s5 + $0x60] sm:$0xff]  ;;  %v127_v29 = vld [vmem:[%s400_s5 + $0x58] sm:$0xff]  ;;  %v126_v30 = vld [vmem:[%s400_s5 + $0x50] sm:$0xff] }
  0x12   :  { %143 = vmatpush.msra.mxu2 %v130_v26  ;;  %v125_v31 = vld [vmem:[%s400_s5 + $0x48] sm:$0xff]  ;;  %v124_v32 = vld [vmem:[%s400_s5 + $0x40] sm:$0xff]  ;;  %v123_v33 = vld [vmem:[%s400_s5 + $0x38] sm:$0xff] }
  0x13   :  { %103 = vmatpush.msra.mxu1 %v76_v16  ;;  %v122_v34 = vld [vmem:[%s400_s5 + $0x30] sm:$0xff]  ;;  %v121_v35 = vld [vmem:[%s400_s5 + $0x28] sm:$0xff]  ;;  %v120_v36 = vld [vmem:[%s400_s5 + $0x20] sm:$0xff] }
  0x14   :  { %144 = vmatpush.msra.mxu2 %v129_v27  ;;  %v119_v37 = vld [vmem:[%s400_s5 + $0x18] sm:$0xff]  ;;  %v118_v38 = vld [vmem:[%s400_s5 + $0x10] sm:$0xff]  ;;  %v188_v39 = vld [vmem:[%s397_s2] ss:$0 sm:$0xff] }
  0x15   :  { %104 = vmatpush.msra.mxu1 %v75_v17  ;;  %v117_v42 = vld [vmem:[%s400_s5 + $0x8] sm:$0xff]  ;;  %v116_v43 = vld [vmem:[%s400_s5] sm:$0xff] }
  0x16   :  { %145 = vmatpush.msra.mxu2 %v128_v28  ;;  %v189_v44 = vld [vmem:[%s399_s4] ss:$0 sm:$0xff] }
  0x17   :  { %105 = vmatpush.msra.mxu1 %v74_v18  ;;  %v190_v47 = vld [vmem:[%s401_s6] ss:$0 sm:$0xff] }
  0x18   :  { %146 = vmatpush.msra.mxu2 %v127_v29 }
  0x19   :  { %106 = vmatpush.msra.mxu1 %v73_v19 }
  0x1a   :  { %147 = vmatpush.msra.mxu2 %v126_v30 }
  0x1b   :  { %107 = vmatpush.msra.mxu1 %v72_v20 }
  0x1c   :  { %148 = vmatpush.msra.mxu2 %v125_v31 }
  0x1d   :  { %108 = vmatpush.msra.mxu1 %v71_v21 }
  0x1e   :  { %149 = vmatpush.msra.mxu2 %v124_v32 }
  0x1f   :  { %109 = vmatpush.msra.mxu1 %v70_v22 }
  0x20   :  { %150 = vmatpush.msra.mxu2 %v123_v33 }
  0x21   :  { %110 = vmatpush.msra.mxu1 %v69_v23 }
  0x22   :  { %151 = vmatpush.msra.mxu2 %v122_v34 }
  0x23   :  { %111 = vmatpush.msra.mxu1 %v68_v24 }
  0x24   :  { %152 = vmatpush.msra.mxu2 %v121_v35 }
  0x26   :  { %153 = vmatpush.msra.mxu2 %v120_v36 }
  0x28   :  { %154 = vmatpush.msra.mxu2 %v119_v37 }
  0x2a   :  { %155 = vmatpush.msra.mxu2 %v118_v38 }
  0x2c   :  { %156 = vmatpush.msra.mxu2 %v117_v42 }
  0x2e   :  { %157 = vmatpush.msra.mxu2 %v116_v43 }
  0x8e   :  { %v65_v40 = vpop.f32.mrf.mxu0 }
  0x8f   :  { %v66_v41 = vadd.f32 %v188_v39, %v65_v40 }
  0x91   :  { %184 = vmatmul.msk.f32.vlgmr.msra.gmra.mxu1 %vm88_vm3, %v66_v41 }
 0x10e   :  { %v113_v45 = vpop.f32.mrf.mxu1 }
 0x10f   :  { %v114_v46 = vadd.f32 %v189_v44, %v113_v45 }
 0x111   :  { %186 = vmatmul.msk.f32.vlgmr.msra.gmra.mxu2 %vm88_vm3, %v114_v46 }
 0x194   :  { %v159_v48 = vpop.f32.mrf.mxu2 }
 0x195   :  { %v160_v49 = vadd.f32 %v190_v47, %v159_v48 }
 0x197   :  { %v162_v50 = vmax.f32 %v160_v49, 0.0 }
 0x199   :  { %164 = vst.msk [vmem:[#allocation2] sm:$0x3] %vm163_vm4, %v162_v50 }
 0x19a   :  { %175 = dma.vmem_to_hbm [thread:$0]  %s171_s13, 32, %s173_s15, [#allocation3]  }
 0x19b   :  { %215 = dma.done.wait [#allocation3], 32  }
 0x19c   :  { %216 = vsyncadd [#allocation3], 4294967264 }
 0x19d   :  { %180 = vsyncpa [#allocation3], 1 }

</bundles_post_ra>
